<compile_context>
chip_gen: v5e
topology: v5e:2x2
jax: 0.10.0
libtpu: 0.0.40
codegen_flags: <defaults>
</compile_context>

<pallas_src>
import functools

import jax
import jax.numpy as jnp
from jax.experimental import pallas as pl
from jax.experimental.pallas import tpu as pltpu


_MAX_TILE_C = 32768  # bounds the unrolled in-kernel lane fold (<=256 vreg adds)


def _cdiv(a, b):
    return (a + b - 1) // b


def _round_up(a, b):
    return _cdiv(a, b) * b


def _sublane_align(dtype):
    """Minimum sublane multiple for a dtype's packed (N,128) tile."""
    return max(8, 32 // jnp.dtype(dtype).itemsize)


def _tile_budget_and_vmem():
    """Per-input tile element budget and vmem limit, per TPU generation."""
    vmem_bytes = None
    try:
        info = pltpu.get_tpu_info()
        vmem_bytes = getattr(info, "vmem_capacity_bytes", None)
    except Exception:  # pragma: no cover - query unavailable off-TPU
        vmem_bytes = None
    if vmem_bytes is not None and vmem_bytes >= (96 << 20):
        # v5e / v6e class: 128 MiB VMEM -> 4 MiB f32 per input per step.
        return 1024 * 1024, 64 << 20
    # v7x class (64 MiB per TC) or unknown: 2 MiB f32 per input per step.
    return 512 * 1024, 32 << 20


def _int_pow(x, n: int):
    """x**n for a static non-negative integer n, by squaring (VPU only)."""
    if n == 0:
        return jnp.ones_like(x)
    result = None
    base = x
    while n > 0:
        if n & 1:
            result = base if result is None else result * base
        n >>= 1
        if n:
            base = base * base
    return result


def _tree_fold(blocks):
    """Pairwise-add a list of equally shaped arrays (log-depth VPU adds)."""
    while len(blocks) > 1:
        nxt = []
        for k in range(0, len(blocks) - 1, 2):
            nxt.append(blocks[k] + blocks[k + 1])
        if len(blocks) % 2:
            nxt.append(blocks[-1])
        blocks = nxt
    return blocks[0]


def _asl_kernel(x_ref, y_ref, out_ref, *,
                gamma_neg, gamma_pos, m, eps, apply_sigmoid,
                binary_targets, int_gammas,
                batch, classes, tile_b, tile_c, mask_rows, mask_cols):
    """One (tile_b, tile_c) tile -> one (8, 128) partial-sum tile."""
    i = pl.program_id(0)
    j = pl.program_id(1)

    x = x_ref[...].astype(jnp.float32)
    y_raw = y_ref[...]                       # native dtype (f32/bf16/int8/...)

    xs_pos = jax.nn.sigmoid(x) if apply_sigmoid else x
    xs_neg = 1.0 - xs_pos
    if m is not None and m > 0:
        xs_neg = jnp.minimum(xs_neg + m, 1.0)

    use_focusing = (gamma_neg > 0) or (gamma_pos > 0)

    if binary_targets:
        # Targets are {0, 1}: fuse the two logs via a select; when gammas are
        # static non-negative ints replace pow with squaring (VPU only).
        pos_mask = y_raw > 0
        p = jnp.where(pos_mask, xs_pos, xs_neg)
        loss = jnp.log(jnp.maximum(p, eps))
        if use_focusing:
            base = 1.0 - p
            if int_gammas:
                gp, gn = int(gamma_pos), int(gamma_neg)
                # Scalar 1.0 for a zero gamma: no full-tile ones temporary.
                wp = 1.0 if gp == 0 else _int_pow(base, gp)
                wn = 1.0 if gn == 0 else _int_pow(base, gn)
                w = jnp.where(pos_mask, wp, wn)
            else:
                gamma = jnp.where(pos_mask, jnp.float32(gamma_pos),
                                  jnp.float32(gamma_neg))
                # guard pow(0, 0) -> NaN (torch.pow(0, 0) == 1)
                w = jnp.power(jnp.maximum(base, 1e-30), gamma)
            loss = loss * w
    else:
        # General (soft-label capable) path, mirrors the PyTorch math.
        # NOTE: jnp.power = exp(g*log(b)) -> 2 extra EUP ops/elem; prefer the
        # binary path whenever targets are known {0,1} (EUP-bound on v7x).
        y = y_raw.astype(jnp.float32)
        anti = 1.0 - y
        loss = y * jnp.log(jnp.maximum(xs_pos, eps))
        loss = loss + anti * jnp.log(jnp.maximum(xs_neg, eps))
        if use_focusing:
            base = 1.0 - xs_pos * y - xs_neg * anti
            gamma = gamma_pos * y + gamma_neg * anti
            w = jnp.power(jnp.maximum(base, 1e-30), gamma)
            loss = loss * w

    # Zero out padded rows / class columns of partial edge blocks.  Narrow
    # (tile_b,1)/(1,tile_c) iotas + broadcasting; MUST stay a where-SELECT so
    # NaN/Inf from undefined edge data cannot propagate into the sums.
    if mask_rows or mask_cols:
        valid = None
        if mask_rows:
            rows = jax.lax.broadcasted_iota(jnp.int32, (tile_b, 1), 0)
            valid = (rows + i * tile_b) < batch
        if mask_cols:
            cols = jax.lax.broadcasted_iota(jnp.int32, (1, tile_c), 1)
            cvalid = (cols + j * tile_c) < classes
            valid = cvalid if valid is None else (valid & cvalid)
        loss = jnp.where(valid, loss, 0.0)

    # Fold (tile_b, tile_c) -> (8, 128) with pure vreg adds (no XLU, no
    # reshape): first fold 128-lane blocks, then 8-row blocks.
    lane_blocks = [loss[:, c * 128:(c + 1) * 128] for c in range(tile_c // 128)]
    folded = _tree_fold(lane_blocks)                      # (tile_b, 128)
    row_blocks = [folded[r * 8:(r + 1) * 8, :] for r in range(tile_b // 8)]
    out_ref[0, 0, :, :] = _tree_fold(row_blocks)          # (8, 128)


def asymmetric_loss(x, y, *, gamma_neg=4.0, gamma_pos=0.0, m=0.05, eps=1e-8,
                    apply_sigmoid=True, assume_binary_targets=True,
                    tile_b=None, tile_c=None):
    """Pallas implementation of AsymmetricLoss.forward. Returns a scalar.

    Set assume_binary_targets=False if soft (non {0,1}) labels may be passed
    (the binary fast path would silently compute a different loss otherwise).
    x may be f32/bf16; y may be f32/bf16/int8/bool (compute is f32 in-kernel).
    """
    assert x.shape == y.shape and x.ndim == 2
    B, C = x.shape

    # Keep targets in a narrow dtype (no wrapper f32 cast -> less HBM traffic).
    if y.dtype == jnp.bool_:
        y = y.astype(jnp.int8)

    # Sublane alignment follows the narrowest input dtype's packed tile.
    row_align = max(_sublane_align(x.dtype), _sublane_align(y.dtype))

    budget, vmem_limit = _tile_budget_and_vmem()

    b_full = _round_up(B, row_align)
    c_full = _round_up(C, 128)

    # --- class (lane) tile: as much of C as the budget allows with at least
    #     row_align rows (long contiguous DMA), capped only for trace size ---
    if tile_c is None:
        tile_c = min(c_full, _MAX_TILE_C,
                     max(128, (budget // row_align) // 128 * 128))
    else:
        tile_c = max(128, _round_up(tile_c, 128))

    # --- batch (sublane) tile fills the remaining element budget ---
    if tile_b is None:
        tile_b = min(b_full,
                     max(row_align, (budget // tile_c) // row_align * row_align))
    else:
        tile_b = min(b_full, max(row_align, _round_up(tile_b, row_align)))

    # Guarantee >= 2 grid programs when possible (v7x has 2 TCs per chip).
    if _cdiv(B, tile_b) * _cdiv(C, tile_c) == 1:
        if tile_b >= 2 * row_align:
            tile_b = _round_up(_cdiv(B, 2), row_align)
        elif tile_c >= 256:
            tile_c = _round_up(_cdiv(C, 2), 128)

    nb, nc = _cdiv(B, tile_b), _cdiv(C, tile_c)
    mask_rows = (B % tile_b) != 0
    mask_cols = (C % tile_c) != 0

    int_gammas = (float(gamma_neg).is_integer() and float(gamma_pos).is_integer()
                  and gamma_neg >= 0 and gamma_pos >= 0)

    kernel = functools.partial(
        _asl_kernel,
        gamma_neg=gamma_neg, gamma_pos=gamma_pos, m=m, eps=eps,
        apply_sigmoid=apply_sigmoid,
        binary_targets=assume_binary_targets, int_gammas=int_gammas,
        batch=B, classes=C, tile_b=tile_b, tile_c=tile_c,
        mask_rows=mask_rows, mask_cols=mask_cols,
    )

    partials = pl.pallas_call(
        kernel,
        out_shape=jax.ShapeDtypeStruct((nb, nc, 8, 128), jnp.float32),
        grid_spec=pltpu.PrefetchScalarGridSpec(
            num_scalar_prefetch=0,
            grid=(nb, nc),
            in_specs=[
                pl.BlockSpec((tile_b, tile_c), lambda i, j: (i, j)),
                pl.BlockSpec((tile_b, tile_c), lambda i, j: (i, j)),
            ],
            out_specs=pl.BlockSpec((1, 1, 8, 128), lambda i, j: (i, j, 0, 0)),
        ),
        compiler_params=pltpu.CompilerParams(
            dimension_semantics=("parallel", "parallel"),
            vmem_limit_bytes=vmem_limit,
        ),
    )(x, y)

    # Tiny final cross-lane reduce + negate outside the kernel.
    return -jnp.sum(partials)


def _asymmetric_loss_ref(x, y, *, gamma_neg=4.0, gamma_pos=0.0, m=0.05,
                         eps=1e-8, apply_sigmoid=True):
    """Pure-JAX reference mirroring the PyTorch forward exactly."""
    x = x.astype(jnp.float32)
    y = y.astype(jnp.float32)
    anti = 1.0 - y
    xs_pos = jax.nn.sigmoid(x) if apply_sigmoid else x
    xs_neg = 1.0 - xs_pos
    if m is not None and m > 0:
        xs_neg = jnp.minimum(xs_neg + m, 1.0)
    loss = y * jnp.log(jnp.maximum(xs_pos, eps))
    loss = loss + anti * jnp.log(jnp.maximum(xs_neg, eps))
    if gamma_neg > 0 or gamma_pos > 0:
        w = jnp.power(1.0 - xs_pos * y - xs_neg * anti,
                      gamma_pos * y + gamma_neg * anti)
        loss = loss * w
    return -jnp.sum(loss)


if __name__ == "__main__":
    # NOTE: disable_torch_grad_focal_loss only affects autograd, not the
    # forward value, so it has no kernel-side equivalent (forward-only here).
    key = jax.random.PRNGKey(0)
    kx, ky = jax.random.split(key)

    # Case 1: aligned shapes, binarized multi-label targets (f32 targets).
    B, C = 16, 128
    x = jax.random.normal(kx, (B, C), dtype=jnp.float32)              # logits
    y = (jax.random.uniform(ky, (B, C)) > 0.5).astype(jnp.float32)    # {0,1}
    loss = jax.block_until_ready(asymmetric_loss(x, y))
    ref = _asymmetric_loss_ref(x, y)
    assert jnp.allclose(loss, ref, rtol=1e-4, atol=1e-4), (loss, ref)

    # Case 2: ragged shapes exercise the no-pad edge-block masking path.
    kx2, ky2 = jax.random.split(ky)
    B2, C2 = 10, 100
    x2 = jax.random.normal(kx2, (B2, C2), dtype=jnp.float32)
    y2 = (jax.random.uniform(ky2, (B2, C2)) > 0.5).astype(jnp.float32)
    loss2 = jax.block_until_ready(asymmetric_loss(x2, y2))
    ref2 = _asymmetric_loss_ref(x2, y2)
    assert jnp.allclose(loss2, ref2, rtol=1e-4, atol=1e-4), (loss2, ref2)

    # Case 3: general (soft-label-safe) path with jnp.power.
    loss3 = jax.block_until_ready(
        asymmetric_loss(x, y, assume_binary_targets=False))
    assert jnp.allclose(loss3, ref, rtol=1e-4, atol=1e-4), (loss3, ref)

    # Case 4: narrow int8 targets (1 byte/elem HBM traffic for y).
    y_i8 = y.astype(jnp.int8)
    loss4 = jax.block_until_ready(asymmetric_loss(x, y_i8))
    assert jnp.allclose(loss4, ref, rtol=1e-4, atol=1e-4), (loss4, ref)

    print("KERNEL_OK")
</pallas_src>

<mosaic_0001>
module attributes {stable_mosaic.version = 11 : i64} {
  func.func @_asl_kernel(%arg0: i32, %arg1: i32, %arg2: memref<8x128xf32, #tpu.memory_space<vmem>>, %arg3: memref<8x128xf32, #tpu.memory_space<vmem>>, %arg4: memref<1x1x8x128xf32, #tpu.memory_space<vmem>>) attributes {dimension_semantics = [#tpu.dimension_semantics<parallel>, #tpu.dimension_semantics<parallel>], iteration_bounds = array<i64: 2, 1>, scalar_prefetch = 0 : i64, scratch_operands = 0 : i64, tpu.core_type = #tpu.core_type<tc>, window_params = [{transform_indices = @transform_0, window_bounds = array<i64: 8, 128>}, {transform_indices = @transform_1, window_bounds = array<i64: 8, 128>}, {transform_indices = @transform_2, window_bounds = array<i64: 1, 1, 8, 128>}]} {
    %c0 = arith.constant 0 : index
    %c0_0 = arith.constant 0 : index
    %0 = vector.load %arg2[%c0, %c0_0] : memref<8x128xf32, #tpu.memory_space<vmem>>, vector<8x128xf32>
    %c0_1 = arith.constant 0 : index
    %c0_2 = arith.constant 0 : index
    %1 = vector.load %arg3[%c0_1, %c0_2] : memref<8x128xf32, #tpu.memory_space<vmem>>, vector<8x128xf32>
    %2 = arith.negf %0 : vector<8x128xf32>
    %3 = math.exp %2 : vector<8x128xf32>
    %cst = arith.constant 1.000000e+00 : f32
    %4 = vector.broadcast %cst : f32 to vector<8x128xf32>
    %5 = arith.addf %4, %3 : vector<8x128xf32>
    %6 = arith.divf %4, %5 : vector<8x128xf32>
    %cst_3 = arith.constant 1.000000e+00 : f32
    %7 = vector.broadcast %cst_3 : f32 to vector<8x128xf32>
    %8 = arith.subf %7, %6 : vector<8x128xf32>
    %cst_4 = arith.constant 5.000000e-02 : f32
    %9 = vector.broadcast %cst_4 : f32 to vector<8x128xf32>
    %10 = arith.addf %8, %9 : vector<8x128xf32>
    %cst_5 = arith.constant 1.000000e+00 : f32
    %11 = vector.broadcast %cst_5 : f32 to vector<8x128xf32>
    %12 = arith.minimumf %10, %11 : vector<8x128xf32>
    %cst_6 = arith.constant 0.000000e+00 : f32
    %13 = vector.broadcast %cst_6 : f32 to vector<8x128xf32>
    %14 = arith.cmpf ogt, %1, %13 : vector<8x128xf32>
    %15 = arith.select %14, %6, %12 : vector<8x128xi1>, vector<8x128xf32>
    %cst_7 = arith.constant 9.99999993E-9 : f32
    %16 = vector.broadcast %cst_7 : f32 to vector<8x128xf32>
    %17 = arith.maximumf %15, %16 : vector<8x128xf32>
    %18 = math.log %17 : vector<8x128xf32>
    %cst_8 = arith.constant 1.000000e+00 : f32
    %19 = vector.broadcast %cst_8 : f32 to vector<8x128xf32>
    %20 = arith.subf %19, %15 : vector<8x128xf32>
    %21 = arith.mulf %20, %20 : vector<8x128xf32>
    %22 = arith.mulf %21, %21 : vector<8x128xf32>
    %cst_9 = arith.constant 1.000000e+00 : f32
    %23 = vector.broadcast %cst_9 : f32 to vector<8x128xf32>
    %24 = arith.select %14, %23, %22 : vector<8x128xi1>, vector<8x128xf32>
    %25 = arith.mulf %18, %24 : vector<8x128xf32>
    %c0_10 = arith.constant 0 : index
    %c0_11 = arith.constant 0 : index
    %c0_12 = arith.constant 0 : index
    %c0_13 = arith.constant 0 : index
    %26 = vector.load %arg4[%c0_10, %c0_11, %c0_12, %c0_13] : memref<1x1x8x128xf32, #tpu.memory_space<vmem>>, vector<1x1x8x128xf32>
    %27 = vector.shape_cast %26 : vector<1x1x8x128xf32> to vector<8x128xf32>
    %28 = vector.shape_cast %25 : vector<8x128xf32> to vector<1x1x8x128xf32>
    tpu.vector_store %arg4[%c0_10, %c0_11, %c0_12, %c0_13], %28 {strides = array<i32>} : memref<1x1x8x128xf32, #tpu.memory_space<vmem>>, vector<1x1x8x128xf32>,
    return
  }
  func.func @transform_0(%arg0: i32, %arg1: i32) -> (i32, i32) {
    %c0_i32 = arith.constant 0 : i32
    return %arg0, %arg1 : i32, i32
  }
  func.func @transform_1(%arg0: i32, %arg1: i32) -> (i32, i32) {
    %c0_i32 = arith.constant 0 : i32
    return %arg0, %arg1 : i32, i32
  }
  func.func @transform_2(%arg0: i32, %arg1: i32) -> (i32, i32, i32, i32) {
    %c0_i32 = arith.constant 0 : i32
    %c0_i32_0 = arith.constant 0 : i32
    %c0_i32_1 = arith.constant 0 : i32
    return %arg0, %arg1, %c0_i32, %c0_i32_0 : i32, i32, i32, i32
  }
}

</mosaic_0001>

<bundles_post_ra>
// kernel: tpu_custom_call.1
= control target key start
LH: loop header
LB: loop body
LE: loop exit
PB: predicated region body
PF: predicated region fallthrough
CT: control target
= control target key end

     0   :  { %7 = vsyncpa [#allocation3], 0  ;;  %s762_s0 = inlined_call_operand.hbm [shape: f32[16,128], index: 0, kind: input, shape index: {}]   ;;  %s763_s1 = inlined_call_operand.hbm [shape: f32[16,128], index: 1, kind: input, shape index: {}]   ;;  %s764_s2 = inlined_call_operand.hbm [shape: f32[2,1,8,128], index: 2, kind: output, shape index: {}]  }
   0x1   :  { %9 = vsyncpa [#allocation3 + $0x1], 0 }
   0x2   :  { %10 = vsyncpa [#allocation6], 0 }
   0x3   :  { %12 = vsyncpa [#allocation6 + $0x1], 0 }
   0x4   :  { %13 = vsyncpa [#allocation4], 0 }
   0x5   :  { %15 = vsyncpa [#allocation4 + $0x1], 0  ;;  %s629_s9 = smov 0   ;;  %s631_s10 = smov 0  }
   0x6   :  { %s633_s11 = smov 0   ;;  %s635_s12 = smov 0  }
   0x7   :  { %s637_s13 = smov 0   ;;  %s639_s14 = smov 0  }
   0x8 LB: > { %s376_s15 = sadd.s32 4294967295, %s612_s14   ;;  %s377_s16 = sadd.s32 4294967294, %s612_s14   ;;  %s612_s14 = sphi %s639_s14, %s21_s14   ;;  %s608_s13 = sphi %s637_s13, %s773_s13   ;;  %s604_s12 = sphi %s635_s12, %s772_s12   ;;  %s600_s11 = sphi %s633_s11, %s771_s11   ;;  %s596_s10 = sphi %s631_s10, %s770_s10   ;;  %s592_s9 = sphi %s629_s9, %s769_s9  }
   0x9   : > { %s33_s17 = sadd.s32 1, %s608_s13  ;;  %s42_s18 = sadd.s32 1, %s600_s11 }
   0xa   : > { %p35_p0 = scmp.ge.s32.totalorder %s33_s17, 2  ;;  %p49_p1 = scmp.ne.s32.totalorder %s600_s11, %s596_s10 }
   0xb   : > { %p50_p2 = scmp.eq.s32.totalorder %s612_s14, 0  ;;  %p55_p3 = scmp.ne.s32.totalorder %s596_s10, %s592_s9 }
   0xc   : > { %s775_s17 = smov (%p35_p0, %s33_s17), 0  ;;  %p56_p5 = scmp.eq.s32.totalorder %s376_s15, 0 }
   0xd   : > { %p670_p4 = por %p50_p2, %p49_p1  ;;  %s37_s20 = ssub.s32 %s608_s13, %s775_s17 }
   0xe   : > { %p109_p6 = scmp.eq.s32.totalorder %s376_s15, 1  ;;  %p40_p7 = scmp.eq.s32.totalorder %s37_s20, 0 }
   0xf   : > { %p676_p8 = por %p56_p5, %p55_p3  ;;  %p115_p10 = scmp.eq.s32.totalorder %s377_s16, 1 }
  0x10   : > { %p680_p9 = por %p109_p6, %p49_p1  ;;  %p379_p12 = scmp.ge.s32.totalorder %s612_s14, 2 }
  0x11   : > { %s685_s23 = scalar_select %p40_p7, %s600_s11, %s42_s18  }
  0x12   : > { %p687_p11 = por %p115_p10, %p55_p3  ;;  %p410_p13 = scmp.lt.s32.totalorder %s612_s14, 2 }
  0x13   : > { %s135_s25 = sand.u32 1, %s600_s11   ;;  %s381_s27 = sshll.u32 %s608_s13, 3 }
  0x14   : > { %s380_s26 = sshll.u32 %s135_s25, 3  ;;  %s144_s30 = scalar_lea.hbm %s762_s0, %s381_s27 }
  0x15   : > { %s139_s3 = scalar_lea.vmem [#allocation2], %s380_s26  ;;  %s146_s5 = sshll.u32 %s144_s30, 4  ;;  %s147_s5 = int_to_ptr.hbm [resolvable:$true] %s146_s5 }
  0x16   : > { %s148_s4 = sshll.u32 %s139_s3, 4  ;;  %p400_p0 = pnand %p410_p13, %p670_p4  ;;  %s149_s4 = int_to_ptr.vmem [resolvable:$true] %s148_s4 }
  0x17   : > { %p384_p1 = scmp.ge.s32.totalorder %s612_s14, 1  ;;  %p173_p2 = scmp.lt.s32.totalorder %s612_s14, 3 }
  0x18   : > { %s136_s6 = scalar_lea.sflag [#allocation3], %s135_s25  ;;  %s164_s15 = scalar_lea.hbm %s763_s1, %s381_s27 }
  0x19   : > { %402 = dma.hbm_to_vmem [thread:$0]  (!%p400_p0), %s147_s5, 128, %s149_s4, %s136_s6  }
  0x1a   : > { %p174_p3 = pnand %p384_p1, %p173_p2  ;;  %s159_s16 = scalar_lea.vmem [#allocation5], %s380_s26 }
  0x1b   : > { %s168_s18 = sshll.u32 %s159_s16, 4  ;;  %s166_s20 = sshll.u32 %s164_s15, 4  ;;  %s169_s18 = int_to_ptr.vmem [resolvable:$true] %s168_s18  ;;  %s167_s20 = int_to_ptr.hbm [resolvable:$true] %s166_s20 }
  0x1c   : > { %s156_s28 = scalar_lea.sflag [#allocation6], %s135_s25  ;;  %177 = sbr.rel (%p174_p3) target bundleno = 88 (0x58), region = 28 }
  0x1d   : > { %405 = dma.hbm_to_vmem [thread:$0]  (!%p400_p0), %s167_s20, 128, %s169_s18, %s156_s28  }
  0x1e   : > { %s706_s19 = sand.u32 (!%p174_p3), 1, %s596_s10  }
  0x1f   : > { %s709_s29 = sshll.u32 (!%p174_p3), %s706_s19, 3  ;;  %s180_s30 = scalar_lea.sflag (!%p174_p3), [#allocation3], %s706_s19 }
  0x20   : > { %s183_s3 = scalar_lea.vmem (!%p174_p3), [#allocation2], %s709_s29 }
  0x21   : > { %579 = dma.done.wait (%p676_p8), %s180_s30, 128  }
  0x22   : > { %581 = vsyncadd (%p676_p8), %s180_s30, 4294967168  ;;  %s190_s25 = scalar_lea.sflag [#allocation6], %s706_s19  ;;  %s193_s26 = scalar_lea.vmem [#allocation5], %s709_s29 }
  0x23   : > { %583 = dma.done.wait (%p676_p8), %s190_s25, 128  }
  0x24   : > { %585 = vsyncadd (%p676_p8), %s190_s25, 4294967168  ;;  %v220_v0 = vld [vmem:[%s183_s3] sm:$0xff]  ;;  %v221_v14 = vld [vmem:[%s193_s26] sm:$0xff]  ;;  %s390_s21 = sshll.u32 %s604_s12, 3  ;;  %s219_s6 = scalar_lea.vmem [#allocation7], %s709_s29 }
  0x25   : > { %v388_v1 = vmul.f32 -1.442695, %v220_v0  ;;  %vm244_vm4 = vcmp.gt.f32.partialorder %v221_v14, 0.0  ;;  %s267_s5 = scalar_lea.hbm %s764_s2, %s390_s21  ;;  %s269_s7 = sshll.u32 %s219_s6, 4  ;;  %s270_s7 = int_to_ptr.vmem [resolvable:$true] %s269_s7 }
  0x26   : > { %s271_s8 = sshll.u32 %s267_s5, 4  ;;  %s256_s15 = scalar_lea.sflag [#allocation4], %s706_s19  ;;  %s272_s8 = int_to_ptr.hbm [resolvable:$true] %s271_s8 }
  0x27   : > { %460 = vpow2.f32 %v388_v1  ;;  %s540_s16 = sshra.s32 %s272_s8, 4  ;;  %s546_s28 = scalar_lea.hbm %s764_s2, 16  ;;  %s541_s16 = int_to_ptr.hbm [resolvable:$true] %s540_s16 }
  0x28   : > { %s542_s12 = scalar_lea.hbm %s541_s16, 8  ;;  %p547_p7 = scmp.lt.s32.totalorder %s541_s16, %s764_s2 }
  0x29   : > { %p543_p4 = scmp.ne.s32.totalorder %s541_s16, %s542_s12  ;;  %p548_p8 = scmp.lt.s32.totalorder %s546_s28, %s542_s12 }
  0x2b   : > { %p544_p5 = pnand %p543_p4, %p680_p9  ;;  %p549_p10 = por %p548_p8, %p547_p7 }
  0x2d   : > { %v461_v2 = vpop.eup %460  ;;  %p545_p6 = pneg %p544_p5 }
  0x2e   : > { %v225_v3 = vadd.f32 1.0, %v461_v2 }
  0x2f   : > { %p550_p13 = pnand %p549_p10, %p545_p6 }
  0x30   : > { %462 = vrcp.f32 %v225_v3  ;;  %v237_v6 = vand.u32 2147483648, %v225_v3  ;;  %vm231_vm0 = vweird.f32 %v225_v3  ;;  %v235_v8 = vand.u32 2147483647, %v225_v3 }
  0x32   : > { %v238_v10 = vor.u32 1.1754944e-38, %v237_v6  ;;  %vm236_vm3 = vcmp.eq.f32.partialorder %v235_v8, 8.507059e+37 }
  0x36   : > { %v463_v4 = vpop.eup %462 }
  0x37   : > { %v227_v5 = vmul.f32 %v463_v4, %v225_v3  ;;  %vm232_vm1 = vweird.f32 %v463_v4 }
  0x38   : > { %vm233_vm2 = vmor %vm231_vm0, %vm232_vm1 }
  0x39   : > { %v228_v7 = vsub.f32 1.0, %v227_v5 }
  0x3b   : > { %v229_v9 = vmul.f32 %v463_v4, %v228_v7 }
  0x3d   : > { %v230_v11 = vadd.f32 %v463_v4, %v229_v9 }
  0x3f   : > { %v234_v12 = vsel %vm233_vm2, %v463_v4, %v230_v11 }
  0x40   : > { %v239_v13 = vsel %vm236_vm3, %v238_v10, %v234_v12 }
  0x41   : > { %v241_v15 = vsub.f32 1.0, %v239_v13 }
  0x43   : > { %v242_v16 = vadd.f32 0.05, %v241_v15 }
  0x45   : > { %v243_v17 = vmin.f32 %v242_v16, 1.0 }
  0x47   : > { %v245_v18 = vsel %vm244_vm4, %v239_v13, %v243_v17 }
  0x48   : > { %v246_v19 = vmax.f32 %v245_v18, 1e-08  ;;  %v249_v20 = vsub.f32 1.0, %v245_v18 }
  0x4a   : > { %464 = vlog2.f32 %v246_v19  ;;  %v250_v21 = vmul.f32 %v249_v20, %v249_v20 }
  0x4c   : > { %v251_v22 = vmul.f32 %v250_v21, %v250_v21 }
  0x4e   : > { %v252_v24 = vsel %vm244_vm4, 1.0, %v251_v22 }
  0x50   : > { %v465_v23 = vpop.eup %464 }
  0x51   : > { %v248_v25 = vmul.f32 0.6931472, %v465_v23 }
  0x53   : > { %v253_v26 = vmul.f32 %v252_v24, %v248_v25 }
  0x55   : > { %254 = vst [vmem:[%s219_s6] sm:$0xff] %v253_v26 }
  0x56   : > { %553 = shalt.err (!%p550_p13)
}
  0x57   : > { %397 = dma.vmem_to_hbm [thread:$0]  (%p680_p9), %s270_s7, 128, %s272_s8, %s256_s15  }
  0x58 PF: > { %s283_s19 = sand.u32 1, %s592_s9   ;;  %p407_p0 = pnand %p379_p12, %p687_p11 }
  0x59   : > { %s284_s3 = scalar_lea.sflag [#allocation4], %s283_s19 }
  0x5a   : > { %p408_p1 = pneg %p407_p0 }
  0x5c   : > { %587 = dma.done.wait (%p408_p1), %s284_s3, 128  }
  0x5d   : > { %589 = vsyncadd (%p408_p1), %s284_s3, 4294967168  ;;  %s21_s14 = sadd.s32 1, %s612_s14   ;;  %s769_s9 = smov %s596_s10 }
  0x5e   : > { %p18_p2 = scmp.ge.s32.totalorder %s21_s14, 4   ;;  %s770_s10 = smov %s600_s11 }
  0x5f   : > { %s771_s11 = smov %s685_s23  ;;  %s772_s12 = smov %s608_s13 }
  0x60   : > { %s773_s13 = smov %s775_s17  ;;  %20 = sbr.rel (!%p18_p2) target bundleno = 8 (0x8), region = 86 }
  0x65   :  { %290 = vsyncpa [#allocation3], 1 }
  0x66   :  { %292 = vsyncpa [#allocation3 + $0x1], 1 }
  0x67   :  { %293 = vsyncpa [#allocation6], 1 }
  0x68   :  { %295 = vsyncpa [#allocation6 + $0x1], 1 }
  0x69   :  { %296 = vsyncpa [#allocation4], 1 }
  0x6a   :  { %298 = vsyncpa [#allocation4 + $0x1], 1 }

</bundles_post_ra>
